<compile_context>
chip_gen: v6e
topology: v6e:2x2x1
jax: 0.10.0
libtpu: 0.0.40
codegen_flags: <defaults>
</compile_context>

<pallas_src>
import functools

import jax
import jax.numpy as jnp
from jax import lax
from jax.experimental import pallas as pl
from jax.experimental.pallas import tpu as pltpu


def _roll_rows(h, shift):
    """Static roll along the row (sublane) axis, shift normalized to be non-negative."""
    return pltpu.roll(h, shift=shift % h.shape[0], axis=0)


def _shift_prev(h, keep_mask):
    """rows -> h[l-1]; keep_mask zeroes rows at the start of each sample (l % L == 0)."""
    return jnp.where(keep_mask, _roll_rows(h, 1), 0.0)


def _shift_next(h, keep_mask):
    """rows -> h[l+1]; keep_mask zeroes rows at the end of each sample (l % L == L-1)."""
    return jnp.where(keep_mask, _roll_rows(h, -1), 0.0)


def _cnn_regressor_kernel(x_ref, w1_ref, b1_ref, w2_ref, b2_ref, w3_ref, b3_ref,
                          wfc_ref, bfc_ref, out_ref, *, seq_len):
    L = seq_len
    BL = x_ref.shape[0]          # tile_b * L
    tb = BL // L

    x = x_ref[...]               # (BL, 1) f32

    # Per-row "position within sample" masks, shared by all three conv layers.
    l_idx = lax.broadcasted_iota(jnp.int32, (BL, 1), 0) % L
    not_first = l_idx != 0       # x[l-1] exists within the sample
    not_last = l_idx != (L - 1)  # x[l+1] exists within the sample

    # --- conv1 (Cin=1): VPU broadcast FMAs; shift the per-tap products. ---
    w1 = w1_ref[...]             # (3, 16): w1[k, cout]
    h1 = (_shift_prev(x * w1[0:1, :], not_first)
          + x * w1[1:2, :]
          + _shift_next(x * w1[2:3, :], not_last)
          + b1_ref[...])
    h1 = jnp.maximum(h1, 0.0)    # (BL, 16)

    # --- conv2: im2col (lane-concat of the three taps) -> one MXU matmul. ---
    lhs2 = jnp.concatenate(
        [_shift_prev(h1, not_first), h1, _shift_next(h1, not_last)], axis=1)  # (BL, 48)
    h2 = jnp.dot(lhs2, w2_ref[...], preferred_element_type=jnp.float32) + b2_ref[...]
    h2 = jnp.maximum(h2, 0.0)    # (BL, 32)

    # --- conv3: same fused im2col matmul. ---
    lhs3 = jnp.concatenate(
        [_shift_prev(h2, not_first), h2, _shift_next(h2, not_last)], axis=1)  # (BL, 96)
    h3 = jnp.dot(lhs3, w3_ref[...], preferred_element_type=jnp.float32) + b3_ref[...]
    h3 = jnp.maximum(h3, 0.0)    # (BL, 64)

    # --- AdaptiveAvgPool1d(1): sum over L (1/L folded into the FC weight). ---
    pooled = jnp.sum(h3.reshape(tb, L, 64), axis=1)   # (tb, 64)

    # --- Linear(64, n_users) on the lane-padded output slab. ---
    out = jnp.dot(pooled, wfc_ref[...], preferred_element_type=jnp.float32) + bfc_ref[...]
    out_ref[...] = out.astype(out_ref.dtype)


def cnn_regressor_forward(x_blc, kernel_params, *, tile_b=None):
    """x_blc: (B, L, 1) float32 (channels-last).  Returns (B, n_users) float32."""
    B, L, cin = x_blc.shape
    assert cin == 1
    w1, b1, w2, b2, w3, b3, wfc, bfc = kernel_params
    n_users = wfc.shape[1]

    # Lane-dense output: pad n_users up to a multiple of 128 so the writeback is an
    # unmasked store; padding columns are zero-weighted and sliced off afterwards.
    n_pad = ((n_users + 127) // 128) * 128
    wfc_p = jnp.pad(wfc, ((0, 0), (0, n_pad - n_users))) * (1.0 / L)  # fold avg-pool 1/L
    bfc_p = jnp.pad(bfc, ((0, 0), (0, n_pad - n_users)))

    # Batch tiling: keep tile_b*L around <=4096 rows so the per-tile live set stays a
    # few MiB (safe vs the 32 MiB scoped-VMEM default, incl. v7x's 64 MiB physical).
    # Multiple tiles -> "parallel" grid axis so dual-TC chips get work.
    if tile_b is None:
        tile_b = max(1, min(B, max(8, 4096 // L)))
    n_tiles = pl.cdiv(B, tile_b)
    B_pad = n_tiles * tile_b
    if B_pad != B:
        x_blc = jnp.pad(x_blc, ((0, B_pad - B), (0, 0), (0, 0)))
    x_flat = x_blc.reshape(B_pad * L, 1)   # flattened (B*L, 1) slab

    rows = tile_b * L
    full2 = lambda arr: pl.BlockSpec(arr.shape, lambda i: (0, 0))

    out = pl.pallas_call(
        functools.partial(_cnn_regressor_kernel, seq_len=L),
        out_shape=jax.ShapeDtypeStruct((B_pad, n_pad), jnp.float32),
        grid_spec=pltpu.PrefetchScalarGridSpec(
            num_scalar_prefetch=0,
            grid=(n_tiles,),
            in_specs=[
                pl.BlockSpec((rows, 1), lambda i: (i, 0)),   # x, flattened rows
                full2(w1), full2(b1),
                full2(w2), full2(b2),
                full2(w3), full2(b3),
                full2(wfc_p), full2(bfc_p),
            ],
            out_specs=pl.BlockSpec((tile_b, n_pad), lambda i: (i, 0)),
        ),
        compiler_params=pltpu.CompilerParams(dimension_semantics=("parallel",)),
    )(x_flat, w1, b1, w2, b2, w3, b3, wfc_p, bfc_p)

    return out[:B, :n_users]


def make_params(key, n_users):
    """Deterministic synthetic parameters (PyTorch-shaped + kernel layout)."""
    ks = jax.random.split(key, 8)
    # PyTorch Conv1d weight shape: (Cout, Cin, K); Linear: (n_users, 64).
    w1_t = jax.random.normal(ks[0], (16, 1, 3), jnp.float32) * 0.3
    b1 = jax.random.normal(ks[1], (16,), jnp.float32) * 0.1
    w2_t = jax.random.normal(ks[2], (32, 16, 3), jnp.float32) * 0.1
    b2 = jax.random.normal(ks[3], (32,), jnp.float32) * 0.1
    w3_t = jax.random.normal(ks[4], (64, 32, 3), jnp.float32) * 0.1
    b3 = jax.random.normal(ks[5], (64,), jnp.float32) * 0.1
    wfc_t = jax.random.normal(ks[6], (n_users, 64), jnp.float32) * 0.1
    bfc = jax.random.normal(ks[7], (n_users,), jnp.float32) * 0.1

    torch_params = (w1_t, b1, w2_t, b2, w3_t, b3, wfc_t, bfc)

    # Kernel layout:
    #   conv1 weight  -> (K, Cout)              (Cin == 1, used on the VPU)
    #   conv2/3 weight-> im2col (K*Cin, Cout)   rows ordered k-major / cin-minor,
    #                    matching the [prev | center | next] lane-concat of the LHS
    #   biases        -> (1, C)
    #   fc weight     -> (64, n_users)          (avg-pool's 1/L is folded in later)
    kernel_params = (
        jnp.transpose(w1_t[:, 0, :], (1, 0)), b1[None, :],
        jnp.transpose(w2_t, (2, 1, 0)).reshape(3 * 16, 32), b2[None, :],
        jnp.transpose(w3_t, (2, 1, 0)).reshape(3 * 32, 64), b3[None, :],
        wfc_t.T, bfc[None, :],
    )
    return torch_params, kernel_params


def ref_forward_ncl(x_ncl, torch_params):
    """Pure-JAX reference replicating the PyTorch forward (NCL layout)."""
    w1, b1, w2, b2, w3, b3, wfc, bfc = torch_params
    dn = ("NCH", "OIH", "NCH")
    h = x_ncl
    for w, b in ((w1, b1), (w2, b2), (w3, b3)):
        h = lax.conv_general_dilated(h, w, window_strides=(1,),
                                     padding=((1, 1),), dimension_numbers=dn)
        h = jnp.maximum(h + b[None, :, None], 0.0)
    pooled = jnp.mean(h, axis=2)          # AdaptiveAvgPool1d(1) + squeeze(2)
    return pooled @ wfc.T + bfc           # nn.Linear


if __name__ == "__main__":
    key = jax.random.PRNGKey(0)
    k_x, k_p = jax.random.split(key)

    B, L = 2, 16            # batch=2, input_dim (sequence length) = 16
    n_users = 32            # synthetic stand-in for len(users)

    # PyTorch-style input: (B, 1, L)  (N, C, L)
    x_ncl = jax.random.normal(k_x, (B, 1, L), jnp.float32)

    torch_params, kernel_params = make_params(k_p, n_users)

    # Kernel consumes channels-last (B, L, 1).
    x_blc = jnp.transpose(x_ncl, (0, 2, 1))

    out = cnn_regressor_forward(x_blc, kernel_params)
    out = jax.block_until_ready(out)

    ref = ref_forward_ncl(x_ncl, torch_params)
    assert out.shape == (B, n_users), out.shape
    max_err = jnp.max(jnp.abs(out - ref))
    assert jnp.allclose(out, ref, atol=1e-4, rtol=1e-4), f"mismatch: max abs err {max_err}"

    print("KERNEL_OK")
</pallas_src>

<mosaic_0001>
module attributes {stable_mosaic.version = 11 : i64} {
  func.func @_cnn_regressor_kernel(%arg0: i32, %arg1: memref<32x1xf32, #tpu.memory_space<vmem>>, %arg2: memref<3x16xf32, #tpu.memory_space<vmem>>, %arg3: memref<1x16xf32, #tpu.memory_space<vmem>>, %arg4: memref<48x32xf32, #tpu.memory_space<vmem>>, %arg5: memref<1x32xf32, #tpu.memory_space<vmem>>, %arg6: memref<96x64xf32, #tpu.memory_space<vmem>>, %arg7: memref<1x64xf32, #tpu.memory_space<vmem>>, %arg8: memref<64x128xf32, #tpu.memory_space<vmem>>, %arg9: memref<1x128xf32, #tpu.memory_space<vmem>>, %arg10: memref<2x128xf32, #tpu.memory_space<vmem>>) attributes {dimension_semantics = [#tpu.dimension_semantics<parallel>], iteration_bounds = array<i64: 1>, scalar_prefetch = 0 : i64, scratch_operands = 0 : i64, tpu.core_type = #tpu.core_type<tc>, window_params = [{transform_indices = @transform_0, window_bounds = array<i64: 32, 1>}, {pipeline_mode = #tpu.pipeline_mode<synchronous>, transform_indices = @transform_1, window_bounds = array<i64: 3, 16>}, {pipeline_mode = #tpu.pipeline_mode<synchronous>, transform_indices = @transform_2, window_bounds = array<i64: 1, 16>}, {pipeline_mode = #tpu.pipeline_mode<synchronous>, transform_indices = @transform_3, window_bounds = array<i64: 48, 32>}, {pipeline_mode = #tpu.pipeline_mode<synchronous>, transform_indices = @transform_4, window_bounds = array<i64: 1, 32>}, {pipeline_mode = #tpu.pipeline_mode<synchronous>, transform_indices = @transform_5, window_bounds = array<i64: 96, 64>}, {pipeline_mode = #tpu.pipeline_mode<synchronous>, transform_indices = @transform_6, window_bounds = array<i64: 1, 64>}, {pipeline_mode = #tpu.pipeline_mode<synchronous>, transform_indices = @transform_7, window_bounds = array<i64: 64, 128>}, {pipeline_mode = #tpu.pipeline_mode<synchronous>, transform_indices = @transform_8, window_bounds = array<i64: 1, 128>}, {transform_indices = @transform_9, window_bounds = array<i64: 2, 128>}]} {
    %c0 = arith.constant 0 : index
    %c0_0 = arith.constant 0 : index
    %0 = vector.load %arg1[%c0, %c0_0] : memref<32x1xf32, #tpu.memory_space<vmem>>, vector<32x1xf32>
    %1 = tpu.iota {dimensions = array<i32: 0>} : vector<32x1xi32>
    %c16_i32 = arith.constant 16 : i32
    %c0_i32 = arith.constant 0 : i32
    %2 = arith.cmpi eq, %c16_i32, %c0_i32 : i32
    %c1_i32 = arith.constant 1 : i32
    %3 = arith.select %2, %c1_i32, %c16_i32 : i32
    %4 = vector.broadcast %3 : i32 to vector<32x1xi32>
    %5 = arith.remsi %1, %4 : vector<32x1xi32>
    %c0_i32_1 = arith.constant 0 : i32
    %6 = vector.broadcast %c0_i32_1 : i32 to vector<32x1xi32>
    %7 = arith.cmpi ne, %5, %6 : vector<32x1xi32>
    %c0_i32_2 = arith.constant 0 : i32
    %8 = vector.broadcast %c0_i32_2 : i32 to vector<32x1xi32>
    %9 = arith.cmpi slt, %5, %8 : vector<32x1xi32>
    %c0_i32_3 = arith.constant 0 : i32
    %10 = arith.cmpi slt, %3, %c0_i32_3 : i32
    %11 = vector.broadcast %10 : i1 to vector<32x1xi1>
    %12 = vector.broadcast %11 : vector<32x1xi1> to vector<32x1xi1>
    %13 = arith.xori %9, %12 : vector<32x1xi1>
    %14 = arith.andi %13, %7 : vector<32x1xi1>
    %15 = vector.broadcast %3 : i32 to vector<32x1xi32>
    %16 = arith.addi %5, %15 : vector<32x1xi32>
    %17 = arith.select %14, %16, %5 : vector<32x1xi1>, vector<32x1xi32>
    %c0_i32_4 = arith.constant 0 : i32
    %18 = vector.broadcast %c0_i32_4 : i32 to vector<32x1xi32>
    %19 = arith.cmpi ne, %17, %18 : vector<32x1xi32>
    %c15_i32 = arith.constant 15 : i32
    %20 = vector.broadcast %c15_i32 : i32 to vector<32x1xi32>
    %21 = arith.cmpi ne, %17, %20 : vector<32x1xi32>
    %c0_5 = arith.constant 0 : index
    %c0_6 = arith.constant 0 : index
    %22 = vector.load %arg2[%c0_5, %c0_6] : memref<3x16xf32, #tpu.memory_space<vmem>>, vector<3x16xf32>
    %23 = vector.extract_strided_slice %22 {offsets = [0, 0], sizes = [1, 16], strides = [1, 1]} : vector<3x16xf32> to vector<1x16xf32>
    %24 = vector.broadcast %0 : vector<32x1xf32> to vector<32x16xf32>
    %25 = vector.broadcast %23 : vector<1x16xf32> to vector<32x16xf32>
    %26 = arith.mulf %24, %25 : vector<32x16xf32>
    %c1_i32_7 = arith.constant 1 : i32
    %27 = tpu.dynamic_rotate %26 by %c1_i32_7 dim 0 : vector<32x16xf32>, i32 -> vector<32x16xf32>
    %cst = arith.constant 0.000000e+00 : f32
    %28 = vector.shape_cast %19 : vector<32x1xi1> to vector<32x1xi1>
    %29 = vector.broadcast %28 : vector<32x1xi1> to vector<32x16xi1>
    %30 = vector.broadcast %cst : f32 to vector<32x16xf32>
    %31 = arith.select %29, %27, %30 : vector<32x16xi1>, vector<32x16xf32>
    %32 = vector.extract_strided_slice %22 {offsets = [1, 0], sizes = [1, 16], strides = [1, 1]} : vector<3x16xf32> to vector<1x16xf32>
    %33 = vector.broadcast %0 : vector<32x1xf32> to vector<32x16xf32>
    %34 = vector.broadcast %32 : vector<1x16xf32> to vector<32x16xf32>
    %35 = arith.mulf %33, %34 : vector<32x16xf32>
    %36 = arith.addf %31, %35 : vector<32x16xf32>
    %37 = vector.extract_strided_slice %22 {offsets = [2, 0], sizes = [1, 16], strides = [1, 1]} : vector<3x16xf32> to vector<1x16xf32>
    %38 = vector.broadcast %0 : vector<32x1xf32> to vector<32x16xf32>
    %39 = vector.broadcast %37 : vector<1x16xf32> to vector<32x16xf32>
    %40 = arith.mulf %38, %39 : vector<32x16xf32>
    %c31_i32 = arith.constant 31 : i32
    %41 = tpu.dynamic_rotate %40 by %c31_i32 dim 0 : vector<32x16xf32>, i32 -> vector<32x16xf32>
    %cst_8 = arith.constant 0.000000e+00 : f32
    %42 = vector.shape_cast %21 : vector<32x1xi1> to vector<32x1xi1>
    %43 = vector.broadcast %42 : vector<32x1xi1> to vector<32x16xi1>
    %44 = vector.broadcast %cst_8 : f32 to vector<32x16xf32>
    %45 = arith.select %43, %41, %44 : vector<32x16xi1>, vector<32x16xf32>
    %46 = arith.addf %36, %45 : vector<32x16xf32>
    %c0_9 = arith.constant 0 : index
    %c0_10 = arith.constant 0 : index
    %47 = vector.load %arg3[%c0_9, %c0_10] : memref<1x16xf32, #tpu.memory_space<vmem>>, vector<1x16xf32>
    %48 = vector.broadcast %47 : vector<1x16xf32> to vector<32x16xf32>
    %49 = arith.addf %46, %48 : vector<32x16xf32>
    %cst_11 = arith.constant 0.000000e+00 : f32
    %50 = vector.broadcast %cst_11 : f32 to vector<32x16xf32>
    %51 = arith.maximumf %49, %50 : vector<32x16xf32>
    %c1_i32_12 = arith.constant 1 : i32
    %52 = tpu.dynamic_rotate %51 by %c1_i32_12 dim 0 : vector<32x16xf32>, i32 -> vector<32x16xf32>
    %cst_13 = arith.constant 0.000000e+00 : f32
    %53 = vector.shape_cast %19 : vector<32x1xi1> to vector<32x1xi1>
    %54 = vector.broadcast %53 : vector<32x1xi1> to vector<32x16xi1>
    %55 = vector.broadcast %cst_13 : f32 to vector<32x16xf32>
    %56 = arith.select %54, %52, %55 : vector<32x16xi1>, vector<32x16xf32>
    %c31_i32_14 = arith.constant 31 : i32
    %57 = tpu.dynamic_rotate %51 by %c31_i32_14 dim 0 : vector<32x16xf32>, i32 -> vector<32x16xf32>
    %cst_15 = arith.constant 0.000000e+00 : f32
    %58 = vector.shape_cast %21 : vector<32x1xi1> to vector<32x1xi1>
    %59 = vector.broadcast %58 : vector<32x1xi1> to vector<32x16xi1>
    %60 = vector.broadcast %cst_15 : f32 to vector<32x16xf32>
    %61 = arith.select %59, %57, %60 : vector<32x16xi1>, vector<32x16xf32>
    %62 = tpu.concatenate %56, %51, %61 in 1 : vector<32x16xf32>, vector<32x16xf32>, vector<32x16xf32> -> vector<32x48xf32>
    %c0_16 = arith.constant 0 : index
    %c0_17 = arith.constant 0 : index
    %63 = vector.load %arg4[%c0_16, %c0_17] : memref<48x32xf32, #tpu.memory_space<vmem>>, vector<48x32xf32>
    %cst_18 = arith.constant dense<0.000000e+00> : vector<32x32xf32>
    %64 = tpu.matmul %62, %63, %cst_18 {dimension_numbers = #tpu.dot_dimension_numbers<[1], [0], [0], [1], [0, 0, 1, 1], [], []>} : vector<32x48xf32>, vector<48x32xf32>, vector<32x32xf32> -> vector<32x32xf32>
    %c0_19 = arith.constant 0 : index
    %c0_20 = arith.constant 0 : index
    %65 = vector.load %arg5[%c0_19, %c0_20] : memref<1x32xf32, #tpu.memory_space<vmem>>, vector<1x32xf32>
    %66 = vector.broadcast %65 : vector<1x32xf32> to vector<32x32xf32>
    %67 = arith.addf %64, %66 : vector<32x32xf32>
    %cst_21 = arith.constant 0.000000e+00 : f32
    %68 = vector.broadcast %cst_21 : f32 to vector<32x32xf32>
    %69 = arith.maximumf %67, %68 : vector<32x32xf32>
    %c1_i32_22 = arith.constant 1 : i32
    %70 = tpu.dynamic_rotate %69 by %c1_i32_22 dim 0 : vector<32x32xf32>, i32 -> vector<32x32xf32>
    %cst_23 = arith.constant 0.000000e+00 : f32
    %71 = vector.shape_cast %19 : vector<32x1xi1> to vector<32x1xi1>
    %72 = vector.broadcast %71 : vector<32x1xi1> to vector<32x32xi1>
    %73 = vector.broadcast %cst_23 : f32 to vector<32x32xf32>
    %74 = arith.select %72, %70, %73 : vector<32x32xi1>, vector<32x32xf32>
    %c31_i32_24 = arith.constant 31 : i32
    %75 = tpu.dynamic_rotate %69 by %c31_i32_24 dim 0 : vector<32x32xf32>, i32 -> vector<32x32xf32>
    %cst_25 = arith.constant 0.000000e+00 : f32
    %76 = vector.shape_cast %21 : vector<32x1xi1> to vector<32x1xi1>
    %77 = vector.broadcast %76 : vector<32x1xi1> to vector<32x32xi1>
    %78 = vector.broadcast %cst_25 : f32 to vector<32x32xf32>
    %79 = arith.select %77, %75, %78 : vector<32x32xi1>, vector<32x32xf32>
    %80 = tpu.concatenate %74, %69, %79 in 1 : vector<32x32xf32>, vector<32x32xf32>, vector<32x32xf32> -> vector<32x96xf32>
    %c0_26 = arith.constant 0 : index
    %c0_27 = arith.constant 0 : index
    %81 = vector.load %arg6[%c0_26, %c0_27] : memref<96x64xf32, #tpu.memory_space<vmem>>, vector<96x64xf32>
    %cst_28 = arith.constant dense<0.000000e+00> : vector<32x64xf32>
    %82 = tpu.matmul %80, %81, %cst_28 {dimension_numbers = #tpu.dot_dimension_numbers<[1], [0], [0], [1], [0, 0, 1, 1], [], []>} : vector<32x96xf32>, vector<96x64xf32>, vector<32x64xf32> -> vector<32x64xf32>
    %c0_29 = arith.constant 0 : index
    %c0_30 = arith.constant 0 : index
    %83 = vector.load %arg7[%c0_29, %c0_30] : memref<1x64xf32, #tpu.memory_space<vmem>>, vector<1x64xf32>
    %84 = vector.broadcast %83 : vector<1x64xf32> to vector<32x64xf32>
    %85 = arith.addf %82, %84 : vector<32x64xf32>
    %cst_31 = arith.constant 0.000000e+00 : f32
    %86 = vector.broadcast %cst_31 : f32 to vector<32x64xf32>
    %87 = arith.maximumf %85, %86 : vector<32x64xf32>
    %88 = vector.shape_cast %87 : vector<32x64xf32> to vector<2x16x64xf32>
    %cst_32 = arith.constant dense<0.000000e+00> : vector<2x64xf32>
    %89 = vector.multi_reduction <add>, %88, %cst_32 [1] : vector<2x16x64xf32> to vector<2x64xf32>
    %c0_33 = arith.constant 0 : index
    %c0_34 = arith.constant 0 : index
    %90 = vector.load %arg8[%c0_33, %c0_34] : memref<64x128xf32, #tpu.memory_space<vmem>>, vector<64x128xf32>
    %cst_35 = arith.constant dense<0.000000e+00> : vector<2x128xf32>
    %91 = tpu.matmul %89, %90, %cst_35 {dimension_numbers = #tpu.dot_dimension_numbers<[1], [0], [0], [1], [0, 0, 1, 1], [], []>} : vector<2x64xf32>, vector<64x128xf32>, vector<2x128xf32> -> vector<2x128xf32>
    %c0_36 = arith.constant 0 : index
    %c0_37 = arith.constant 0 : index
    %92 = vector.load %arg9[%c0_36, %c0_37] : memref<1x128xf32, #tpu.memory_space<vmem>>, vector<1x128xf32>
    %93 = vector.broadcast %92 : vector<1x128xf32> to vector<2x128xf32>
    %94 = arith.addf %91, %93 : vector<2x128xf32>
    %c0_38 = arith.constant 0 : index
    %c0_39 = arith.constant 0 : index
    %95 = vector.load %arg10[%c0_38, %c0_39] : memref<2x128xf32, #tpu.memory_space<vmem>>, vector<2x128xf32>
    tpu.vector_store %arg10[%c0_38, %c0_39], %94 {strides = array<i32>} : memref<2x128xf32, #tpu.memory_space<vmem>>, vector<2x128xf32>,
    return
  }
  func.func @transform_0(%arg0: i32) -> (i32, i32) {
    %c0_i32 = arith.constant 0 : i32
    %c0_i32_0 = arith.constant 0 : i32
    return %arg0, %c0_i32 : i32, i32
  }
  func.func @transform_1(%arg0: i32) -> (i32, i32) {
    %c0_i32 = arith.constant 0 : i32
    %c0_i32_0 = arith.constant 0 : i32
    %c0_i32_1 = arith.constant 0 : i32
    return %c0_i32, %c0_i32_0 : i32, i32
  }
  func.func @transform_2(%arg0: i32) -> (i32, i32) {
    %c0_i32 = arith.constant 0 : i32
    %c0_i32_0 = arith.constant 0 : i32
    %c0_i32_1 = arith.constant 0 : i32
    return %c0_i32, %c0_i32_0 : i32, i32
  }
  func.func @transform_3(%arg0: i32) -> (i32, i32) {
    %c0_i32 = arith.constant 0 : i32
    %c0_i32_0 = arith.constant 0 : i32
    %c0_i32_1 = arith.constant 0 : i32
    return %c0_i32, %c0_i32_0 : i32, i32
  }
  func.func @transform_4(%arg0: i32) -> (i32, i32) {
    %c0_i32 = arith.constant 0 : i32
    %c0_i32_0 = arith.constant 0 : i32
    %c0_i32_1 = arith.constant 0 : i32
    return %c0_i32, %c0_i32_0 : i32, i32
  }
  func.func @transform_5(%arg0: i32) -> (i32, i32) {
    %c0_i32 = arith.constant 0 : i32
    %c0_i32_0 = arith.constant 0 : i32
    %c0_i32_1 = arith.constant 0 : i32
    return %c0_i32, %c0_i32_0 : i32, i32
  }
  func.func @transform_6(%arg0: i32) -> (i32, i32) {
    %c0_i32 = arith.constant 0 : i32
    %c0_i32_0 = arith.constant 0 : i32
    %c0_i32_1 = arith.constant 0 : i32
    return %c0_i32, %c0_i32_0 : i32, i32
  }
  func.func @transform_7(%arg0: i32) -> (i32, i32) {
    %c0_i32 = arith.constant 0 : i32
    %c0_i32_0 = arith.constant 0 : i32
    %c0_i32_1 = arith.constant 0 : i32
    return %c0_i32, %c0_i32_0 : i32, i32
  }
  func.func @transform_8(%arg0: i32) -> (i32, i32) {
    %c0_i32 = arith.constant 0 : i32
    %c0_i32_0 = arith.constant 0 : i32
    %c0_i32_1 = arith.constant 0 : i32
    return %c0_i32, %c0_i32_0 : i32, i32
  }
  func.func @transform_9(%arg0: i32) -> (i32, i32) {
    %c0_i32 = arith.constant 0 : i32
    %c0_i32_0 = arith.constant 0 : i32
    return %arg0, %c0_i32 : i32, i32
  }
}

</mosaic_0001>

<bundles_post_ra>
// kernel: tpu_custom_call.1
= control target key start
LH: loop header
LB: loop body
LE: loop exit
PB: predicated region body
PF: predicated region fallthrough
CT: control target
= control target key end

     0   :  { %v845_v2 = vmov 0   ;;  %s1146_s0 = inlined_call_operand.vmem [shape: f32[32,1], index: 0, kind: input, shape index: {}]   ;;  %s1147_s1 = inlined_call_operand.vmem [shape: f32[3,16], index: 1, kind: input, shape index: {}]   ;;  %s1148_s2 = inlined_call_operand.vmem [shape: f32[1,16], index: 2, kind: input, shape index: {}]   ;;  %s1149_s3 = inlined_call_operand.vmem [shape: f32[48,32], index: 3, kind: input, shape index: {}]   ;;  %s1150_s4 = inlined_call_operand.vmem [shape: f32[1,32], index: 4, kind: input, shape index: {}]   ;;  %s1151_s5 = inlined_call_operand.vmem [shape: f32[96,64], index: 5, kind: input, shape index: {}]   ;;  %s1152_s6 = inlined_call_operand.vmem [shape: f32[1,64], index: 6, kind: input, shape index: {}]   ;;  %s1153_s7 = inlined_call_operand.vmem [shape: f32[64,128], index: 7, kind: input, shape index: {}]   ;;  %s1154_s8 = inlined_call_operand.vmem [shape: f32[1,128], index: 8, kind: input, shape index: {}]   ;;  %s1155_s9 = inlined_call_operand.hbm [shape: f32[2,128], index: 9, kind: output, shape index: {}]  }
   0x1   :  { %v35_v0 = vld [vmem:[%s1146_s0 + $0x10] sm:$0xff]  ;;  %v33_v1 = vld [vmem:[%s1146_s0] sm:$0xff]  ;;  %822 = vset.pattern.permute.xlu1 %v845_v2  ;;  %821 = vset.pattern.permute.xlu0 %v845_v2 }
   0x2   :  { %14 = vsyncpa [#allocation3], 0  ;;  %111 = vperm.xlu1 %822, %v35_v0   ;;  %101 = vperm.xlu0 %821, %v33_v1   ;;  %v36_v3 = vld [vmem:[%s1146_s0 + $0x18] sm:$0xff]  ;;  %v34_v4 = vld [vmem:[%s1146_s0 + $0x8] sm:$0xff]  ;;  %v37_v6 = vlaneseq  ;;  %s846_s30 = smov 16   ;;  %vm264_vm6 = vcmask 130048  }
   0x3   :  { %v279_v5 = vld [vmem:[%s1149_s3 + $0x28] sm:$0xff]  ;;  %v98_v10 = vld [vmem:[%s1147_s1] sm:$0x7]  ;;  %v277_v42 = vld [vmem:[%s1149_s3 + $0x18] sm:$0xff]  ;;  %vm269_vm7 = vcmask 261120   ;;  %vm287_vm8 = vcmask 392192  }
   0x4   :  { %747 = vmatprep.subr.mxu0 %v279_v5  ;;  %v917_v7 = vshrl.u32 %v37_v6, 7  ;;  %v278_v41 = vld [vmem:[%s1149_s3 + $0x20] sm:$0xff]  ;;  %v276_v59 = vld [vmem:[%s1149_s3 + $0x10] sm:$0xff]  ;;  %v275_v60 = vld [vmem:[%s1149_s3 + $0x8] sm:$0xff]  ;;  %vm449_vm9 = vcmask 523264   ;;  %vm473_vm10 = vcmask 785408  }
   0x5   :  { %748 = vmatpush3.msra.mxu0 %v279_v5  ;;  %v699_v63 = vld [vmem:[%s1148_s2] ss:$0 sm:$0xff]  ;;  %v600_v36 = vld [vmem:[%s1153_s7 + $0x38] sm:$0xff]  ;;  %vm850_vm11 = vmmov 0   ;;  %vm610_vm12 = vcmask 1041409   ;;  %s851_s26 = smov [#allocation2]  }
   0x6   :  { %116 = vperm.xlu1 %822, %v36_v3   ;;  %106 = vperm.xlu0 %821, %v34_v4   ;;  %v121_v8 = vsub.s32 0, %v917_v7  ;;  %v162_v9 = vsub.s32 2, %v917_v7  ;;  %v39_v11 = vadd.s32 8, %v917_v7  ;;  %v41_v12 = vadd.s32 24, %v917_v7  ;;  %s691_s27 = sshll.u32 %s851_s26, 4  ;;  %s692_s27 = int_to_ptr.vmem [resolvable:$true] %s691_s27 }
   0x7   :  { %v40_v13 = vadd.s32 16, %v917_v7  ;;  %v150_v16 = vsub.s32 1, %v917_v7  ;;  %v46_v20 = vand.u32 15, %v917_v7  ;;  %vm131_vm0 = vcmp.lt.s32.totalorder %v917_v7, 1  ;;  %749 = vmatprep.subr.mxu0 %v278_v41  ;;  %s823_s28 = scalar_lea.vmem %s692_s27, 32  ;;  %p828_p1 = scmp.lt.s32.totalorder %s692_s27, %s692_s27 }
   0x8   :  { %v122_v14 = vrot.slane %v98_v10, %v121_v8  ;;  %v163_v15 = vrot.slane %v98_v10, %v162_v9  ;;  %v53_v19 = vand.u32 15, %v39_v11  ;;  %v67_v21 = vand.u32 15, %v41_v12  ;;  %750 = vmatpush3.msra.mxu0 %v278_v41  ;;  %p824_p0 = scmp.ne.s32.totalorder %s692_s27, %s823_s28  ;;  %p829_p2 = scmp.lt.s32.totalorder %s823_s28, %s823_s28 }
   0x9   :  { %v60_v22 = vand.u32 15, %v40_v13  ;;  %v151_v25 = vrot.slane %v98_v10, %v150_v16  ;;  %vm172_vm1 = vcmp.lt.s32.totalorder %v917_v7, 7  ;;  %vm935_vm3 = vcmp.ne.s32.totalorder %v46_v20, 0  ;;  %751 = vmatprep.subr.mxu0 %v277_v42  ;;  %v274_v10 = vld [vmem:[%s1149_s3] sm:$0xff]  ;;  %s847_s3 = smov 32  }
   0xa   :  { %vm931_vm2 = vcmp.ne.s32.totalorder %v53_v19, 15  ;;  %vm939_vm4 = vcmp.ne.s32.totalorder %v67_v21, 15  ;;  %752 = vmatpush3.msra.mxu0 %v277_v42  ;;  %p830_p3 = por %p829_p2, %p828_p1 }
   0xb   :  { %vm943_vm5 = vcmp.ne.s32.totalorder %v60_v22, 0  ;;  %753 = vmatprep.subr.mxu0 %v276_v59 }
   0xc   :  { %754 = vmatpush3.msra.mxu0 %v276_v59  ;;  %p831_p4 = pnand %p830_p3, %p824_p0 }
   0xd   :  { %755 = vmatprep.subr.mxu0 %v275_v60 }
   0xe   :  { %756 = vmatpush3.msra.mxu0 %v275_v60 }
   0xf   :  { %757 = vmatprep.subr.mxu0 %v274_v10 }
  0x10   :  { %758 = vmatpush3.msra.mxu0 %v274_v10  ;;  %v454_v10 = vld [vmem:[%s1151_s5] sm:$0xff] }
  0x7d   :  { %v112_v17 = vpop.permute.xlu1 %111  ;;  %v102_v18 = vpop.permute.xlu0 %101 }
  0x7e   :  { %v125_v23 = vmul.f32 %v122_v14, %v112_v17  ;;  %v166_v24 = vmul.f32 %v163_v15, %v112_v17  ;;  %v123_v26 = vmul.f32 %v122_v14, %v102_v18  ;;  %v164_v27 = vmul.f32 %v163_v15, %v102_v18 }
  0x7f   :  { %v152_v39 = vmul.f32 %v151_v25, %v102_v18  ;;  %v154_v61 = vmul.f32 %v151_v25, %v112_v17 }
  0x80   :  { %v129_v37 = vrot.slane %v125_v23, 7  ;;  %v170_v38 = vrot.slane %v166_v24, 1  ;;  %v127_v43 = vrot.slane %v123_v26, 7  ;;  %v168_v47 = vrot.slane %v164_v27, 1 }
  0x81   :  { %v117_v28 = vpop.permute.xlu1 %116  ;;  %v107_v29 = vpop.permute.xlu0 %106 }
  0x82   :  { %v126_v33 = vmul.f32 %v122_v14, %v117_v28  ;;  %v167_v34 = vmul.f32 %v163_v15, %v117_v28  ;;  %v124_v35 = vmul.f32 %v122_v14, %v107_v29  ;;  %v165_v40 = vmul.f32 %v163_v15, %v107_v29 }
  0x83   :  { %v155_v48 = vmul.f32 %v151_v25, %v117_v28  ;;  %v153_v49 = vmul.f32 %v151_v25, %v107_v29 }
  0x84   :  { %v130_v44 = vrot.slane %v126_v33, 7  ;;  %v171_v45 = vrot.slane %v167_v34, 1  ;;  %v128_v46 = vrot.slane %v124_v35, 7  ;;  %v169_v50 = vrot.slane %v165_v40, 1 }
  0x86   :  { %v132_v51 = vsel %vm131_vm0, %v129_v37, %v130_v44  ;;  %v135_v52 = vsel %vm131_vm0, %v130_v44, %v127_v43  ;;  %v133_v53 = vsel %vm131_vm0, %v128_v46, %v129_v37  ;;  %v134_v54 = vsel %vm131_vm0, %v127_v43, %v128_v46 }
  0x87   :  { %v159_v55 = vadd.f32 %v155_v48, %v132_v51  ;;  %v157_v56 = vadd.f32 %v153_v49, %v134_v54  ;;  %v174_v57 = vsel %vm172_vm1, %v169_v50, %v170_v38  ;;  %v144_v58 = vsel %vm935_vm3, %v135_v52, 0.0 }
  0x88   :  { %v186_v62 = vsel %vm931_vm2, %v174_v57, 0.0  ;;  %v156_v0 = vadd.f32 %v152_v39, %v144_v58  ;;  %v176_v1 = vsel %vm172_vm1, %v171_v45, %v168_v47  ;;  %v175_v3 = vsel %vm172_vm1, %v168_v47, %v169_v50 }
  0x89   :  { %v190_v2 = vadd.f32 %v186_v62, %v157_v56  ;;  %v188_v4 = vsel %vm939_vm4, %v176_v1, 0.0  ;;  %v146_v5 = vsel %vm943_vm5, %v133_v53, 0.0  ;;  %v173_v12 = vsel %vm172_vm1, %v170_v38, %v171_v45  ;;  %v464_v62 = vld [vmem:[%s1151_s5 + $0x50] sm:$0xff]  ;;  %v461_v1 = vld [vmem:[%s1151_s5 + $0x38] sm:$0xff] }
  0x8a   :  { %v189_v6 = vadd.f32 %v175_v3, %v156_v0  ;;  %v192_v8 = vadd.f32 %v188_v4, %v159_v55  ;;  %v158_v9 = vadd.f32 %v154_v61, %v146_v5  ;;  %v465_v61 = vld [vmem:[%s1151_s5 + $0x58] sm:$0xff]  ;;  %v462_v0 = vld [vmem:[%s1151_s5 + $0x40] sm:$0xff]  ;;  %v459_v3 = vld [vmem:[%s1151_s5 + $0x28] sm:$0xff] }
  0x8b   :  { %v201_v11 = vadd.f32 %v699_v63, %v190_v2  ;;  %765 = vmatprep.subr.mxu1 %v465_v61  ;;  %v460_v2 = vld [vmem:[%s1151_s5 + $0x30] sm:$0xff]  ;;  %v458_v4 = vld [vmem:[%s1151_s5 + $0x20] sm:$0xff]  ;;  %v457_v5 = vld [vmem:[%s1151_s5 + $0x18] sm:$0xff] }
  0x8c   :  { %v200_v13 = vadd.f32 %v699_v63, %v189_v6  ;;  %v203_v14 = vadd.f32 %v699_v63, %v192_v8  ;;  %v191_v15 = vadd.f32 %v173_v12, %v158_v9  ;;  %766 = vmatpush3.msra.mxu1 %v465_v61  ;;  %v456_v6 = vld [vmem:[%s1151_s5 + $0x10] sm:$0xff]  ;;  %v455_v8 = vld [vmem:[%s1151_s5 + $0x8] sm:$0xff]  ;;  %v700_v9 = vld [vmem:[%s1150_s4] ss:$0 sm:$0xff]  ;;  %s848_s4 = smov 64  }
  0x8d   :  { %v205_v16 = vmax.f32 %v201_v11, 0.0  ;;  %767 = vmatprep.subr.mxu1 %v464_v62  ;;  %v598_v61 = vld [vmem:[%s1153_s7 + $0x28] sm:$0xff] }
  0x8e   :  { %v204_v17 = vmax.f32 %v200_v13, 0.0  ;;  %v207_v18 = vmax.f32 %v203_v14, 0.0  ;;  %v202_v19 = vadd.f32 %v699_v63, %v191_v15  ;;  %v463_v63 = vld [vmem:[%s1151_s5 + $0x48] sm:$0xff]  ;;  %768 = vmatpush3.msra.mxu1 %v464_v62  ;;  %v597_v62 = vld [vmem:[%s1153_s7 + $0x20] sm:$0xff] }
  0x8f   :  { %238 = vrot.lane.b32.xlu1 %v205_v16, %s846_s30  ;;  %v209_v20 = vrot.slane %v205_v16, 7  ;;  %v221_v23 = vrot.slane %v205_v16, 1  ;;  %769 = vmatprep.subr.mxu1 %v463_v63 }
  0x90   :  { %236 = vrot.lane.b32.xlu0 %v204_v17, %s846_s30  ;;  %v211_v21 = vrot.slane %v207_v18, 7  ;;  %v206_v22 = vmax.f32 %v202_v19, 0.0  ;;  %v208_v24 = vrot.slane %v204_v17, 7  ;;  %v220_v27 = vrot.slane %v204_v17, 1  ;;  %770 = vmatpush3.msra.mxu1 %v463_v63  ;;  %v596_v63 = vld [vmem:[%s1153_s7 + $0x18] sm:$0xff] }
  0x91   :  { %v223_v28 = vrot.slane %v207_v18, 1  ;;  %771 = vmatprep.subr.mxu1 %v462_v0 }
  0x92   :  { %v222_v25 = vrot.slane %v206_v22, 1  ;;  %v210_v26 = vrot.slane %v206_v22, 7  ;;  %v214_v29 = vsel %vm131_vm0, %v208_v24, %v209_v20  ;;  %v215_v33 = vsel %vm131_vm0, %v211_v21, %v208_v24  ;;  %772 = vmatpush3.msra.mxu1 %v462_v0  ;;  %v595_v0 = vld [vmem:[%s1153_s7 + $0x10] sm:$0xff] }
  0x93   :  { %242 = vrot.lane.b32.xlu1 %v207_v18, %s846_s30  ;;  %v226_v39 = vsel %vm172_vm1, %v220_v27, %v221_v23  ;;  %v227_v40 = vsel %vm172_vm1, %v223_v28, %v220_v27  ;;  %v216_v47 = vsel %vm935_vm3, %v215_v33, 0.0  ;;  %773 = vmatprep.subr.mxu1 %v461_v1 }
  0x94   :  { %240 = vrot.lane.b32.xlu0 %v206_v22, %s846_s30  ;;  %v225_v34 = vsel %vm172_vm1, %v221_v23, %v222_v25  ;;  %v212_v35 = vsel %vm131_vm0, %v210_v26, %v211_v21  ;;  %v213_v37 = vsel %vm131_vm0, %v209_v20, %v210_v26  ;;  %v231_v41 = vsel %vm939_vm4, %v227_v40, 0.0  ;;  %774 = vmatpush3.msra.mxu1 %v461_v1  ;;  %v594_v1 = vld [vmem:[%s1153_s7 + $0x8] sm:$0xff] }
  0x95   :  { %v229_v38 = vsel %vm931_vm2, %v225_v34, 0.0  ;;  %v224_v42 = vsel %vm172_vm1, %v222_v25, %v223_v28  ;;  %v218_v54 = vsel %vm943_vm5, %v213_v37, 0.0  ;;  %775 = vmatprep.subr.mxu1 %v460_v2 }
  0x96   :  { %776 = vmatpush3.msra.mxu1 %v460_v2  ;;  %v593_v2 = vld [vmem:[%s1153_s7] sm:$0xff] }
  0x97   :  { %254 = vrot.lane.b32.xlu1 %v229_v38, %s847_s3  ;;  %777 = vmatprep.subr.mxu1 %v459_v3 }
  0x98   :  { %252 = vrot.lane.b32.xlu0 %v226_v39, %s847_s3  ;;  %778 = vmatpush3.msra.mxu1 %v459_v3  ;;  %v705_v3 = vld [vmem:[%s1152_s6] ss:$0 sm:$0xff] }
  0x99   :  { %779 = vmatprep.subr.mxu1 %v458_v4 }
  0x9a   :  { %780 = vmatpush3.msra.mxu1 %v458_v4 }
  0x9b   :  { %258 = vrot.lane.b32.xlu1 %v231_v41, %s847_s3  ;;  %781 = vmatprep.subr.mxu1 %v457_v5 }
  0x9c   :  { %256 = vrot.lane.b32.xlu0 %v224_v42, %s847_s3  ;;  %782 = vmatpush3.msra.mxu1 %v457_v5 }
  0x9d   :  { %783 = vmatprep.subr.mxu1 %v456_v6 }
  0x9e   :  { %784 = vmatpush3.msra.mxu1 %v456_v6 }
  0x9f   :  { %785 = vmatprep.subr.mxu1 %v455_v8 }
  0xa0   :  { %786 = vmatpush3.msra.mxu1 %v455_v8 }
  0xa1   :  { %787 = vmatprep.subr.mxu1 %v454_v10 }
  0xa2   :  { %788 = vmatpush3.msra.mxu1 %v454_v10 }
 0x101   :  { %v239_v43 = vpop.permute.xlu1 %238 }
 0x102   :  { %v237_v44 = vpop.permute.xlu0 %236  ;;  %v266_v51 = vsel %vm264_vm6, %v214_v29, %v239_v43 }
 0x103   :  { %v265_v49 = vsel %vm264_vm6, %v216_v47, %v237_v44 }
 0x105   :  { %v243_v45 = vpop.permute.xlu1 %242 }
 0x106   :  { %v241_v46 = vpop.permute.xlu0 %240  ;;  %v268_v58 = vsel %vm264_vm6, %v212_v35, %v243_v45 }
 0x107   :  { %v267_v56 = vsel %vm264_vm6, %v218_v54, %v241_v46 }
 0x109   :  { %v255_v48 = vpop.permute.xlu1 %254 }
 0x10a   :  { %v253_v50 = vpop.permute.xlu0 %252  ;;  %v271_v53 = vsel %vm269_vm7, %v266_v51, %v255_v48 }
 0x10b   :  { %v270_v52 = vsel %vm269_vm7, %v265_v49, %v253_v50 }
 0x10c   :  { %759 = vmatprep.mubr.msk.f32.mxu0 %vm287_vm8, %v270_v52 }
 0x10d   :  { %760 = vmatmul.mubr.msk.f32.vlgmr.msra.gmra.mxu0 %vm287_vm8, %v271_v53  ;;  %v259_v55 = vpop.permute.xlu1 %258 }
 0x10e   :  { %v257_v57 = vpop.permute.xlu0 %256  ;;  %v273_v60 = vsel %vm269_vm7, %v268_v58, %v259_v55 }
 0x10f   :  { %v272_v59 = vsel %vm269_vm7, %v267_v56, %v257_v57 }
 0x110   :  { %762 = vmatprep.mubr.msk.f32.mxu0 %vm287_vm8, %v272_v59  ;;  %v849_v59 = vmov 0.0  }
 0x111   :  { %763 = vmatmul.mubr.msk.f32.gmra.mxu0 %vm287_vm8, %v273_v60  ;;  %795 = vmatprep.subr.mxu0 %v849_v59  ;;  %v599_v60 = vld [vmem:[%s1153_s7 + $0x30] sm:$0xff] }
 0x112   :  { %796 = vmatpush3.msra.mxu0 %v600_v36  ;;  %811 = vmatprep.mubr.msk.f32.mxu0 %vm850_vm11, %v849_v59 }
 0x113   :  { %797 = vmatprep.subr.mxu0 %v849_v59 }
 0x114   :  { %798 = vmatpush3.msra.mxu0 %v599_v60 }
 0x115   :  { %799 = vmatprep.subr.mxu0 %v849_v59 }
 0x116   :  { %800 = vmatpush3.msra.mxu0 %v598_v61 }
 0x117   :  { %801 = vmatprep.subr.mxu0 %v849_v59 }
 0x118   :  { %802 = vmatpush3.msra.mxu0 %v597_v62 }
 0x119   :  { %803 = vmatprep.subr.mxu0 %v849_v59 }
 0x11a   :  { %804 = vmatpush3.msra.mxu0 %v596_v63 }
 0x11b   :  { %805 = vmatprep.subr.mxu0 %v849_v59 }
 0x11c   :  { %806 = vmatpush3.msra.mxu0 %v595_v0 }
 0x11d   :  { %807 = vmatprep.subr.mxu0 %v849_v59 }
 0x11e   :  { %808 = vmatpush3.msra.mxu0 %v594_v1 }
 0x11f   :  { %809 = vmatprep.subr.mxu0 %v849_v59 }
 0x120   :  { %810 = vmatpush3.msra.mxu0 %v593_v2 }
 0x1cd   :  { %v761_v11 = vpop.f32.mrf.mxu0 }
 0x1ce   :  { %v372_v12 = vadd.f32 %v761_v11, %v700_v9 }
 0x1cf   :  { %v366_v13 = vpop.f32.mrf.mxu0 }
 0x1d0   :  { %v386_v14 = vmax.f32 %v372_v12, 0.0  ;;  %v367_v15 = vadd.f32 %v700_v9, %v366_v13 }
 0x1d1   :  { %v764_v16 = vpop.f32.mrf.mxu0 }
 0x1d2   :  { %v385_v17 = vmax.f32 %v367_v15, 0.0  ;;  %v382_v18 = vadd.f32 %v764_v16, %v700_v9  ;;  %419 = vrot.lane.b32.xlu1 %v386_v14, %s847_s3  ;;  %v402_v19 = vrot.slane %v386_v14, 1  ;;  %v390_v25 = vrot.slane %v386_v14, 7 }
 0x1d3   :  { %v376_v20 = vpop.f32.mrf.mxu0 }
 0x1d4   :  { %v389_v21 = vrot.slane %v385_v17, 7  ;;  %v401_v22 = vrot.slane %v385_v17, 1  ;;  %v388_v23 = vmax.f32 %v382_v18, 0.0  ;;  %v377_v24 = vadd.f32 %v700_v9, %v376_v20  ;;  %417 = vrot.lane.b32.xlu0 %v385_v17, %s847_s3 }
 0x1d6   :  { %v392_v26 = vrot.slane %v388_v23, 7  ;;  %v387_v27 = vmax.f32 %v377_v24, 0.0  ;;  %423 = vrot.lane.b32.xlu1 %v388_v23, %s847_s3  ;;  %v407_v28 = vsel %vm172_vm1, %v401_v22, %v402_v19  ;;  %v395_v29 = vsel %vm131_vm0, %v389_v21, %v390_v25 }
 0x1d7   :  { %v404_v33 = vrot.slane %v388_v23, 1 }
 0x1d8   :  { %v391_v34 = vrot.slane %v387_v27, 7  ;;  %v403_v35 = vrot.slane %v387_v27, 1  ;;  %433 = vrot.lane.b32.xlu0 %v407_v28, %s848_s4  ;;  %v396_v37 = vsel %vm131_vm0, %v392_v26, %v389_v21 }
 0x1d9   :  { %v408_v42 = vsel %vm172_vm1, %v404_v33, %v401_v22  ;;  %v397_v30 = vsel %vm935_vm3, %v396_v37, 0.0 }
 0x1da   :  { %v406_v38 = vsel %vm172_vm1, %v402_v19, %v403_v35  ;;  %v393_v39 = vsel %vm131_vm0, %v391_v34, %v392_v26  ;;  %v394_v40 = vsel %vm131_vm0, %v390_v25, %v391_v34  ;;  %v412_v43 = vsel %vm939_vm4, %v408_v42, 0.0 }
 0x1db   :  { %v410_v41 = vsel %vm931_vm2, %v406_v38, 0.0  ;;  %v405_v44 = vsel %vm172_vm1, %v403_v35, %v404_v33  ;;  %v399_v31 = vsel %vm943_vm5, %v394_v40, 0.0  ;;  %v710_v40 = vld [vmem:[%s1154_s8] ss:$0 sm:$0xff] }
 0x1dc   :  { %421 = vrot.lane.b32.xlu0 %v387_v27, %s847_s3  ;;  %435 = vrot.lane.b32.xlu1 %v410_v41, %s848_s4 }
 0x1e0   :  { %439 = vrot.lane.b32.xlu1 %v412_v43, %s848_s4  ;;  %437 = vrot.lane.b32.xlu0 %v405_v44, %s848_s4 }
 0x244   :  { %v420_v45 = vpop.permute.xlu1 %419 }
 0x245   :  { %v446_v7 = vsel %vm269_vm7, %v395_v29, %v420_v45 }
 0x246   :  { %v418_v46 = vpop.permute.xlu0 %417 }
 0x247   :  { %v445_v47 = vsel %vm269_vm7, %v397_v30, %v418_v46 }
 0x248   :  { %v424_v48 = vpop.permute.xlu1 %423 }
 0x249   :  { %v448_v53 = vsel %vm269_vm7, %v393_v39, %v424_v48 }
 0x24a   :  { %v434_v49 = vpop.permute.xlu0 %433 }
 0x24b   :  { %v450_v50 = vsel %vm449_vm9, %v445_v47, %v434_v49 }
 0x24c   :  { %789 = vmatprep.mubr.msk.f32.mxu1 %vm473_vm10, %v450_v50 }
 0x24e   :  { %v422_v32 = vpop.permute.xlu0 %421  ;;  %v436_v51 = vpop.permute.xlu1 %435 }
 0x24f   :  { %v451_v52 = vsel %vm449_vm9, %v446_v7, %v436_v51  ;;  %v447_v54 = vsel %vm269_vm7, %v399_v31, %v422_v32 }
 0x250   :  { %790 = vmatmul.mubr.msk.f32.vlgmr.msra.gmra.mxu1 %vm473_vm10, %v451_v52 }
 0x252   :  { %v440_v55 = vpop.permute.xlu1 %439  ;;  %v438_v56 = vpop.permute.xlu0 %437 }
 0x253   :  { %v453_v57 = vsel %vm449_vm9, %v448_v53, %v440_v55  ;;  %v452_v58 = vsel %vm449_vm9, %v447_v54, %v438_v56 }
 0x254   :  { %792 = vmatprep.mubr.msk.f32.mxu1 %vm473_vm10, %v452_v58 }
 0x255   :  { %793 = vmatmul.mubr.msk.f32.gmra.mxu1 %vm473_vm10, %v453_v57 }
 0x310   :  { %v791_v4 = vpop.f32.mrf.mxu1 }
 0x311   :  { %v558_v5 = vadd.f32 %v791_v4, %v705_v3 }
 0x312   :  { %v552_v6 = vpop.f32.mrf.mxu1 }
 0x313   :  { %v572_v8 = vmax.f32 %v558_v5, 0.0  ;;  %v553_v9 = vadd.f32 %v705_v3, %v552_v6 }
 0x315   :  { %v571_v10 = vmax.f32 %v553_v9, 0.0  ;;  %v794_v11 = vpop.f32.mrf.mxu1  ;;  %v576_v13 = vsel %vm449_vm9, %v572_v8, 0.0 }
 0x316   :  { %v568_v12 = vadd.f32 %v794_v11, %v705_v3 }
 0x317   :  { %v575_v14 = vsel %vm449_vm9, %v571_v10, 0.0  ;;  %v562_v15 = vpop.f32.mrf.mxu1 }
 0x318   :  { %v577_v16 = vadd.f32 %v576_v13, %v575_v14  ;;  %v574_v17 = vmax.f32 %v568_v12, 0.0  ;;  %v563_v18 = vadd.f32 %v705_v3, %v562_v15 }
 0x31a   :  { %v578_v19 = vrot.slane %v577_v16, 4  ;;  %v573_v20 = vmax.f32 %v563_v18, 0.0  ;;  %v585_v22 = vsel %vm449_vm9, %v574_v17, 0.0 }
 0x31c   :  { %v579_v21 = vadd.f32 %v578_v19, %v577_v16  ;;  %v584_v23 = vsel %vm449_vm9, %v573_v20, 0.0 }
 0x31d   :  { %v586_v24 = vadd.f32 %v585_v22, %v584_v23 }
 0x31e   :  { %v580_v25 = vrot.slane %v579_v21, 2 }
 0x31f   :  { %v587_v26 = vrot.slane %v586_v24, 4 }
 0x320   :  { %v581_v27 = vadd.f32 %v580_v25, %v579_v21 }
 0x321   :  { %v588_v28 = vadd.f32 %v587_v26, %v586_v24 }
 0x322   :  { %v582_v33 = vrot.slane %v581_v27, 1 }
 0x323   :  { %v589_v29 = vrot.slane %v588_v28, 2 }
 0x324   :  { %v583_v37 = vadd.f32 %v582_v33, %v581_v27 }
 0x325   :  { %v590_v34 = vadd.f32 %v589_v29, %v588_v28 }
 0x327   :  { %v591_v35 = vrot.slane %v590_v34, 1 }
 0x329   :  { %v592_v38 = vadd.f32 %v591_v35, %v590_v34 }
 0x32b   :  { %v611_v39 = vsel %vm610_vm12, %v592_v38, %v583_v37 }
 0x32c   :  { %812 = vmatmul.mubr.msk.f32.vlgmr.msra.gmra.mxu0 %vm449_vm9, %v611_v39 }
 0x3ec   :  { %v680_v41 = vpop.f32.mrf.mxu0 }
 0x3ed   :  { %v681_v42 = vadd.f32 %v710_v40, %v680_v41 }
 0x3ee   :  { %v813_v43 = vpop.f32.mrf.mxu0 }
 0x3ef   :  { %684 = vst [vmem:[#allocation2] sm:$0x3] %v681_v42 }
 0x3f0   :  { %834 = shalt.err (!%p831_p4)
}
 0x3f1   :  { %694 = dma.vmem_to_hbm [thread:$0]  %s692_s27, 32, %s1155_s9, [#allocation3]  }
 0x3f2   :  { %843 = dma.done.wait [#allocation3], 32  }
 0x3f3   :  { %844 = vsyncadd [#allocation3], 4294967264 }
 0x3f4   :  { %698 = vsyncpa [#allocation3], 1 }

</bundles_post_ra>
